<compile_context>
chip_gen: v5e
topology: v5e:2x2
jax: 0.10.0
libtpu: 0.0.40
codegen_flags: <defaults>
</compile_context>

<pallas_src>
import jax
import jax.numpy as jnp
from jax.experimental import pallas as pl
from jax.experimental.pallas import tpu as pltpu


# ----------------------------- kernel helpers -------------------------------

def _erf(x):
    # Abramowitz & Stegun 7.1.26, max abs error ~1.5e-7 (f32).
    a1, a2, a3, a4, a5 = (0.254829592, -0.284496736, 1.421413741,
                          -1.453152027, 1.061405429)
    p = 0.3275911
    ax = jnp.abs(x)
    t = 1.0 / (1.0 + p * ax)
    poly = ((((a5 * t + a4) * t + a3) * t + a2) * t + a1) * t
    y = 1.0 - poly * jnp.exp(-ax * ax)          # exp -> EUP slot (cheap)
    return jnp.where(x >= 0.0, y, -y)


def _gelu_exact(x):
    # torch.nn.GELU() default: 0.5 * x * (1 + erf(x / sqrt(2)))
    return 0.5 * x * (1.0 + _erf(x * 0.7071067811865476))


# --------------------------------- kernel ------------------------------------

def embed_fc_label_kernel(x_ref, w1_ref, b1_ref, w2_ref, b2_ref, o_ref):
    # x_ref: (bm, input_dim)  w1_ref: (input_dim, emb)  b1_ref: (1, emb)
    # w2_ref: (emb, emb)      b2_ref: (1, emb)          o_ref: (bm, emb)
    x = x_ref[...]
    h = jnp.dot(x, w1_ref[...], preferred_element_type=jnp.float32)
    h = _gelu_exact(h + b1_ref[...])
    y = jnp.dot(h, w2_ref[...], preferred_element_type=jnp.float32)
    o_ref[...] = (y + b2_ref[...]).astype(o_ref.dtype)


# --------------------------------- wrapper ------------------------------------

def _round_up(n, m):
    return ((n + m - 1) // m) * m


def embed_fc_label_forward(params, x, *, block_m=512):
    """x: (..., input_dim) -> (..., emb_dim); matches EmbedFC_label.forward."""
    orig_shape = x.shape
    input_dim = orig_shape[-1]
    emb_dim = params["w2"].shape[0]

    # Fold all leading dims into one sublane/batch axis (lane-dense design:
    # emb_dim stays on the lane axis, batch on sublanes).
    x2 = x.reshape(-1, input_dim).astype(jnp.float32)
    M = x2.shape[0]

    # Pre-transpose weights once so the kernel does (M,K) x (K,N) matmuls.
    w1 = jnp.transpose(params["w1"]).astype(jnp.float32)      # (input_dim, emb)
    b1 = params["b1"].reshape(1, emb_dim).astype(jnp.float32)
    w2 = jnp.transpose(params["w2"]).astype(jnp.float32)      # (emb, emb)
    b2 = params["b2"].reshape(1, emb_dim).astype(jnp.float32)

    # Tile the flattened batch axis; pad up to a sublane-aligned multiple so the
    # block shape is (8k, input_dim). Weights/biases stay whole (resident).
    bm = max(8, min(block_m, _round_up(M, 8)))
    Mp = _round_up(M, bm)
    if Mp != M:
        x2 = jnp.pad(x2, ((0, Mp - M), (0, 0)))
    grid = (Mp // bm,)

    flops_per_row = 2 * input_dim * emb_dim + 2 * emb_dim * emb_dim
    out = pl.pallas_call(
        embed_fc_label_kernel,
        out_shape=jax.ShapeDtypeStruct((Mp, emb_dim), jnp.float32),
        grid=grid,
        in_specs=[
            pl.BlockSpec((bm, input_dim), lambda i: (i, 0)),       # x tile
            pl.BlockSpec((input_dim, emb_dim), lambda i: (0, 0)),  # w1 (resident)
            pl.BlockSpec((1, emb_dim), lambda i: (0, 0)),          # b1 (resident)
            pl.BlockSpec((emb_dim, emb_dim), lambda i: (0, 0)),    # w2 (resident)
            pl.BlockSpec((1, emb_dim), lambda i: (0, 0)),          # b2 (resident)
        ],
        out_specs=pl.BlockSpec((bm, emb_dim), lambda i: (i, 0)),
        compiler_params=pltpu.CompilerParams(
            dimension_semantics=("parallel",)),
        cost_estimate=pl.CostEstimate(
            flops=Mp * flops_per_row,
            transcendentals=Mp * emb_dim,
            bytes_accessed=4 * (Mp * (input_dim + emb_dim)
                                + input_dim * emb_dim + emb_dim * emb_dim
                                + 2 * emb_dim),
        ),
    )(x2, w1, b1, w2, b2)

    out = out[:M]
    return out.reshape(orig_shape[:-1] + (emb_dim,))


# ------------------------- pure-JAX reference (check) -------------------------

def embed_fc_label_ref(params, x):
    h = x @ params["w1"].T + params["b1"]
    h = jax.nn.gelu(h, approximate=False)   # exact GELU, matches nn.GELU()
    return h @ params["w2"].T + params["b2"]


# ----------------------------------- main -------------------------------------

if __name__ == "__main__":
    B, input_dim, emb_dim = 8, 4, 32

    key = jax.random.PRNGKey(0)
    k0, k1, k2, k3, k4 = jax.random.split(key, 5)

    params = {
        "w1": 0.2 * jax.random.normal(k0, (emb_dim, input_dim), jnp.float32),
        "b1": 0.1 * jax.random.normal(k1, (emb_dim,), jnp.float32),
        "w2": 0.2 * jax.random.normal(k2, (emb_dim, emb_dim), jnp.float32),
        "b2": 0.1 * jax.random.normal(k3, (emb_dim,), jnp.float32),
    }
    x = jax.random.normal(k4, (B, input_dim), jnp.float32)

    out = embed_fc_label_forward(params, x)
    out = jax.block_until_ready(out)

    ref = embed_fc_label_ref(params, x)
    assert out.shape == (B, emb_dim)
    assert jnp.allclose(out, ref, rtol=1e-4, atol=1e-4), \
        f"max abs err = {jnp.max(jnp.abs(out - ref))}"

    print("KERNEL_OK")
</pallas_src>

<mosaic_0001>
module attributes {stable_mosaic.version = 11 : i64} {
  func.func @embed_fc_label_kernel(%arg0: i32, %arg1: memref<8x4xf32, #tpu.memory_space<vmem>>, %arg2: memref<4x32xf32, #tpu.memory_space<vmem>>, %arg3: memref<1x32xf32, #tpu.memory_space<vmem>>, %arg4: memref<32x32xf32, #tpu.memory_space<vmem>>, %arg5: memref<1x32xf32, #tpu.memory_space<vmem>>, %arg6: memref<8x32xf32, #tpu.memory_space<vmem>>) attributes {dimension_semantics = [#tpu.dimension_semantics<parallel>], iteration_bounds = array<i64: 1>, scalar_prefetch = 0 : i64, scratch_operands = 0 : i64, tpu.core_type = #tpu.core_type<tc>, window_params = [{transform_indices = @transform_0, window_bounds = array<i64: 8, 4>}, {pipeline_mode = #tpu.pipeline_mode<synchronous>, transform_indices = @transform_1, window_bounds = array<i64: 4, 32>}, {pipeline_mode = #tpu.pipeline_mode<synchronous>, transform_indices = @transform_2, window_bounds = array<i64: 1, 32>}, {pipeline_mode = #tpu.pipeline_mode<synchronous>, transform_indices = @transform_3, window_bounds = array<i64: 32, 32>}, {pipeline_mode = #tpu.pipeline_mode<synchronous>, transform_indices = @transform_4, window_bounds = array<i64: 1, 32>}, {transform_indices = @transform_5, window_bounds = array<i64: 8, 32>}]} {
    %c0 = arith.constant 0 : index
    %c0_0 = arith.constant 0 : index
    %0 = vector.load %arg1[%c0, %c0_0] : memref<8x4xf32, #tpu.memory_space<vmem>>, vector<8x4xf32>
    %c0_1 = arith.constant 0 : index
    %c0_2 = arith.constant 0 : index
    %1 = vector.load %arg2[%c0_1, %c0_2] : memref<4x32xf32, #tpu.memory_space<vmem>>, vector<4x32xf32>
    %cst = arith.constant dense<0.000000e+00> : vector<8x32xf32>
    %2 = tpu.matmul %0, %1, %cst {dimension_numbers = #tpu.dot_dimension_numbers<[1], [0], [0], [1], [0, 0, 1, 1], [], []>} : vector<8x4xf32>, vector<4x32xf32>, vector<8x32xf32> -> vector<8x32xf32>
    %c0_3 = arith.constant 0 : index
    %c0_4 = arith.constant 0 : index
    %3 = vector.load %arg3[%c0_3, %c0_4] : memref<1x32xf32, #tpu.memory_space<vmem>>, vector<1x32xf32>
    %4 = vector.broadcast %3 : vector<1x32xf32> to vector<8x32xf32>
    %5 = arith.addf %2, %4 : vector<8x32xf32>
    %cst_5 = arith.constant 5.000000e-01 : f32
    %6 = vector.broadcast %cst_5 : f32 to vector<8x32xf32>
    %7 = arith.mulf %6, %5 : vector<8x32xf32>
    %cst_6 = arith.constant 0.707106769 : f32
    %8 = vector.broadcast %cst_6 : f32 to vector<8x32xf32>
    %9 = arith.mulf %5, %8 : vector<8x32xf32>
    %10 = math.absf %9 : vector<8x32xf32>
    %cst_7 = arith.constant 0.327591091 : f32
    %11 = vector.broadcast %cst_7 : f32 to vector<8x32xf32>
    %12 = arith.mulf %11, %10 : vector<8x32xf32>
    %cst_8 = arith.constant 1.000000e+00 : f32
    %13 = vector.broadcast %cst_8 : f32 to vector<8x32xf32>
    %14 = arith.addf %13, %12 : vector<8x32xf32>
    %cst_9 = arith.constant 1.000000e+00 : f32
    %15 = vector.broadcast %cst_9 : f32 to vector<8x32xf32>
    %16 = arith.divf %15, %14 : vector<8x32xf32>
    %cst_10 = arith.constant 1.06140542 : f32
    %17 = vector.broadcast %cst_10 : f32 to vector<8x32xf32>
    %18 = arith.mulf %17, %16 : vector<8x32xf32>
    %cst_11 = arith.constant -1.45315206 : f32
    %19 = vector.broadcast %cst_11 : f32 to vector<8x32xf32>
    %20 = arith.addf %18, %19 : vector<8x32xf32>
    %21 = arith.mulf %20, %16 : vector<8x32xf32>
    %cst_12 = arith.constant 1.42141378 : f32
    %22 = vector.broadcast %cst_12 : f32 to vector<8x32xf32>
    %23 = arith.addf %21, %22 : vector<8x32xf32>
    %24 = arith.mulf %23, %16 : vector<8x32xf32>
    %cst_13 = arith.constant -0.284496725 : f32
    %25 = vector.broadcast %cst_13 : f32 to vector<8x32xf32>
    %26 = arith.addf %24, %25 : vector<8x32xf32>
    %27 = arith.mulf %26, %16 : vector<8x32xf32>
    %cst_14 = arith.constant 0.254829586 : f32
    %28 = vector.broadcast %cst_14 : f32 to vector<8x32xf32>
    %29 = arith.addf %27, %28 : vector<8x32xf32>
    %30 = arith.mulf %29, %16 : vector<8x32xf32>
    %cst_15 = arith.constant 0.000000e+00 : f32
    %31 = vector.broadcast %cst_15 : f32 to vector<8x32xf32>
    %32 = arith.subf %31, %10 : vector<8x32xf32>
    %33 = arith.mulf %32, %10 : vector<8x32xf32>
    %34 = math.exp %33 : vector<8x32xf32>
    %35 = arith.mulf %30, %34 : vector<8x32xf32>
    %cst_16 = arith.constant 1.000000e+00 : f32
    %36 = vector.broadcast %cst_16 : f32 to vector<8x32xf32>
    %37 = arith.subf %36, %35 : vector<8x32xf32>
    %cst_17 = arith.constant 0.000000e+00 : f32
    %38 = vector.broadcast %cst_17 : f32 to vector<8x32xf32>
    %39 = arith.cmpf oge, %9, %38 : vector<8x32xf32>
    %cst_18 = arith.constant 0.000000e+00 : f32
    %40 = vector.broadcast %cst_18 : f32 to vector<8x32xf32>
    %41 = arith.subf %40, %37 : vector<8x32xf32>
    %42 = arith.select %39, %37, %41 : vector<8x32xi1>, vector<8x32xf32>
    %cst_19 = arith.constant 1.000000e+00 : f32
    %43 = vector.broadcast %cst_19 : f32 to vector<8x32xf32>
    %44 = arith.addf %43, %42 : vector<8x32xf32>
    %45 = arith.mulf %7, %44 : vector<8x32xf32>
    %c0_20 = arith.constant 0 : index
    %c0_21 = arith.constant 0 : index
    %46 = vector.load %arg4[%c0_20, %c0_21] : memref<32x32xf32, #tpu.memory_space<vmem>>, vector<32x32xf32>
    %cst_22 = arith.constant dense<0.000000e+00> : vector<8x32xf32>
    %47 = tpu.matmul %45, %46, %cst_22 {dimension_numbers = #tpu.dot_dimension_numbers<[1], [0], [0], [1], [0, 0, 1, 1], [], []>} : vector<8x32xf32>, vector<32x32xf32>, vector<8x32xf32> -> vector<8x32xf32>
    %c0_23 = arith.constant 0 : index
    %c0_24 = arith.constant 0 : index
    %48 = vector.load %arg5[%c0_23, %c0_24] : memref<1x32xf32, #tpu.memory_space<vmem>>, vector<1x32xf32>
    %49 = vector.broadcast %48 : vector<1x32xf32> to vector<8x32xf32>
    %50 = arith.addf %47, %49 : vector<8x32xf32>
    %c0_25 = arith.constant 0 : index
    %c0_26 = arith.constant 0 : index
    %51 = vector.load %arg6[%c0_25, %c0_26] : memref<8x32xf32, #tpu.memory_space<vmem>>, vector<8x32xf32>
    tpu.vector_store %arg6[%c0_25, %c0_26], %50 {strides = array<i32>} : memref<8x32xf32, #tpu.memory_space<vmem>>, vector<8x32xf32>,
    return
  }
  func.func @transform_0(%arg0: i32) -> (i32, i32) {
    %c0_i32 = arith.constant 0 : i32
    %c0_i32_0 = arith.constant 0 : i32
    return %arg0, %c0_i32 : i32, i32
  }
  func.func @transform_1(%arg0: i32) -> (i32, i32) {
    %c0_i32 = arith.constant 0 : i32
    %c0_i32_0 = arith.constant 0 : i32
    %c0_i32_1 = arith.constant 0 : i32
    return %c0_i32, %c0_i32_0 : i32, i32
  }
  func.func @transform_2(%arg0: i32) -> (i32, i32) {
    %c0_i32 = arith.constant 0 : i32
    %c0_i32_0 = arith.constant 0 : i32
    %c0_i32_1 = arith.constant 0 : i32
    return %c0_i32, %c0_i32_0 : i32, i32
  }
  func.func @transform_3(%arg0: i32) -> (i32, i32) {
    %c0_i32 = arith.constant 0 : i32
    %c0_i32_0 = arith.constant 0 : i32
    %c0_i32_1 = arith.constant 0 : i32
    return %c0_i32, %c0_i32_0 : i32, i32
  }
  func.func @transform_4(%arg0: i32) -> (i32, i32) {
    %c0_i32 = arith.constant 0 : i32
    %c0_i32_0 = arith.constant 0 : i32
    %c0_i32_1 = arith.constant 0 : i32
    return %c0_i32, %c0_i32_0 : i32, i32
  }
  func.func @transform_5(%arg0: i32) -> (i32, i32) {
    %c0_i32 = arith.constant 0 : i32
    %c0_i32_0 = arith.constant 0 : i32
    return %arg0, %c0_i32 : i32, i32
  }
}

</mosaic_0001>

<bundles_post_ra>
// kernel: tpu_custom_call.1
= control target key start
LH: loop header
LB: loop body
LE: loop exit
PB: predicated region body
PF: predicated region fallthrough
CT: control target
= control target key end

     0   :  { %10 = vsyncpa [#allocation3], 0  ;;  %s278_s0 = inlined_call_operand.vmem [shape: f32[8,4], index: 0, kind: input, shape index: {}]   ;;  %s279_s1 = inlined_call_operand.vmem [shape: f32[4,32], index: 1, kind: input, shape index: {}]   ;;  %s280_s2 = inlined_call_operand.vmem [shape: f32[1,32], index: 2, kind: input, shape index: {}]   ;;  %s281_s3 = inlined_call_operand.hbm [shape: f32[32,32], index: 3, kind: input, shape index: {}]   ;;  %s282_s4 = inlined_call_operand.vmem [shape: f32[1,32], index: 4, kind: input, shape index: {}]   ;;  %s283_s5 = inlined_call_operand.hbm [shape: f32[8,32], index: 5, kind: output, shape index: {}]  }
   0x1   :  { %11 = vsyncpa [#allocation4], 0  ;;  %s22_s20 = sshll.u32 %s281_s3, 4  ;;  %s226_s21 = smov [#allocation2]   ;;  %s23_s20 = int_to_ptr.hbm [resolvable:$true] %s22_s20 }
   0x2   :  { %s24_s22 = sshll.u32 %s226_s21, 4  ;;  %s227_s23 = smov 128   ;;  %s25_s22 = int_to_ptr.vmem [resolvable:$true] %s24_s22 }
   0x3   :  { %s228_s24 = smov 8  }
   0x4   :  { %30 = dma.hbm_to_vmem [thread:$0]  %s23_s20, 512, %s25_s22, [#allocation3], %s227_s23, %s227_s23, %s228_s24  }
   0x5   :  { %222 = dma.done.wait [#allocation3], 512  }
   0x6   :  { %223 = vsyncadd [#allocation3], 4294966784  ;;  %vm47_vm0 = vcmask 1043456   ;;  %vm43_vm1 = vcmask 31744   ;;  %v38_v0 = vld [vmem:[%s279_s1] sm:$0xf] }
   0x7   :  { %v37_v1 = vld [vmem:[%s278_s0] sm:$0xff]  ;;  %161 = vmatpush.msk.msra.mxu0 %vm47_vm0, %v38_v0  ;;  %v114_v2 = vld [vmem:[#allocation2 + $0x18] sm:$0xff]  ;;  %v113_v3 = vld [vmem:[#allocation2 + $0x10] sm:$0xff]  ;;  %vm119_vm7 = vcmask 261120   ;;  %s151_s8 = sshll.u32 %s283_s5, 4  ;;  %s152_s8 = int_to_ptr.hbm [resolvable:$true] %s151_s8 }
   0x8   :  { %162 = vmatmul.msk.f32.vlgmr.msra.gmra.mxu0 %vm43_vm1, %v37_v1  ;;  %135 = vmatpush.msra.mxu1 %v114_v2  ;;  %v112_v4 = vld [vmem:[#allocation2 + $0x8] sm:$0xff]  ;;  %v111_v5 = vld [vmem:[#allocation2] sm:$0xff] }
   0x9   :  { %v168_v6 = vld [vmem:[%s280_s2] ss:$0 sm:$0xff]  ;;  %s229_s2 = smov [#allocation5]  }
   0xa   :  { %136 = vmatpush.msra.mxu1 %v113_v3  ;;  %v169_v43 = vld [vmem:[%s282_s4] ss:$0 sm:$0xff]  ;;  %s149_s30 = sshll.u32 %s229_s2, 4  ;;  %s150_s30 = int_to_ptr.vmem [resolvable:$true] %s149_s30 }
   0xc   :  { %137 = vmatpush.msra.mxu1 %v112_v4 }
   0xe   :  { %138 = vmatpush.msra.mxu1 %v111_v5 }
  0x85   :  { %v68_v7 = vpop.f32.mrf.mxu0 }
  0x86   :  { %v69_v8 = vadd.f32 %v168_v6, %v68_v7 }
  0x88   :  { %v72_v9 = vmul.f32 0.70710677, %v69_v8  ;;  %v71_v40 = vmul.f32 0.5, %v69_v8 }
  0x8a   :  { %v73_v10 = vand.u32 2147483647, %v72_v9  ;;  %vm106_vm6 = vcmp.ge.f32.partialorder %v72_v9, 0.0 }
  0x8c   :  { %v74_v11 = vmul.f32 0.3275911, %v73_v10  ;;  %v100_v22 = vsub.f32 0.0, %v73_v10 }
  0x8e   :  { %v75_v12 = vadd.f32 1.0, %v74_v11  ;;  %v101_v26 = vmul.f32 %v100_v22, %v73_v10 }
  0x90   :  { %170 = vrcp.f32 %v75_v12  ;;  %v87_v16 = vand.u32 2147483648, %v75_v12  ;;  %v85_v18 = vand.u32 2147483647, %v75_v12  ;;  %vm81_vm3 = vweird.f32 %v75_v12 }
  0x91   :  { %v102_v29 = vmul.f32 1.442695, %v101_v26 }
  0x92   :  { %v88_v20 = vor.u32 1.1754944e-38, %v87_v16  ;;  %vm86_vm5 = vcmp.eq.f32.partialorder %v85_v18, 8.507059e+37 }
  0x93   :  { %172 = vpow2.f32 %v102_v29 }
  0x96   :  { %v171_v13 = vpop.eup %170 }
  0x97   :  { %v77_v14 = vmul.f32 %v171_v13, %v75_v12  ;;  %vm82_vm2 = vweird.f32 %v171_v13 }
  0x98   :  { %vm83_vm4 = vmor %vm81_vm3, %vm82_vm2 }
  0x99   :  { %v78_v15 = vsub.f32 1.0, %v77_v14  ;;  %v173_v35 = vpop.eup %172 }
  0x9b   :  { %v79_v17 = vmul.f32 %v171_v13, %v78_v15 }
  0x9d   :  { %v80_v19 = vadd.f32 %v171_v13, %v79_v17 }
  0x9f   :  { %v84_v21 = vsel %vm83_vm4, %v171_v13, %v80_v19 }
  0xa0   :  { %v89_v23 = vsel %vm86_vm5, %v88_v20, %v84_v21 }
  0xa1   :  { %v91_v24 = vmul.f32 1.0614054, %v89_v23 }
  0xa3   :  { %v92_v25 = vadd.f32 -1.4531521, %v91_v24 }
  0xa5   :  { %v93_v27 = vmul.f32 %v92_v25, %v89_v23 }
  0xa7   :  { %v94_v28 = vadd.f32 1.4214138, %v93_v27 }
  0xa9   :  { %v95_v30 = vmul.f32 %v94_v28, %v89_v23 }
  0xab   :  { %v96_v31 = vadd.f32 -0.28449672, %v95_v30 }
  0xad   :  { %v97_v32 = vmul.f32 %v96_v31, %v89_v23 }
  0xaf   :  { %v98_v33 = vadd.f32 0.2548296, %v97_v32 }
  0xb1   :  { %v99_v34 = vmul.f32 %v98_v33, %v89_v23 }
  0xb3   :  { %v104_v36 = vmul.f32 %v173_v35, %v99_v34 }
  0xb5   :  { %v105_v37 = vsub.f32 1.0, %v104_v36 }
  0xb7   :  { %v107_v38 = vsub.f32 0.0, %v105_v37 }
  0xb9   :  { %v108_v39 = vsel %vm106_vm6, %v105_v37, %v107_v38 }
  0xba   :  { %v109_v41 = vadd.f32 1.0, %v108_v39 }
  0xbc   :  { %v110_v42 = vmul.f32 %v109_v41, %v71_v40 }
  0xbe   :  { %163 = vmatmul.msk.f32.vlgmr.msra.gmra.mxu1 %vm119_vm7, %v110_v42 }
 0x13b   :  { %v140_v44 = vpop.f32.mrf.mxu1 }
 0x13c   :  { %v141_v45 = vadd.f32 %v169_v43, %v140_v44 }
 0x13e   :  { %143 = vst.msk [vmem:[#allocation5] sm:$0xff] %vm119_vm7, %v141_v45 }
 0x13f   :  { %154 = dma.vmem_to_hbm [thread:$0]  %s150_s30, 128, %s152_s8, [#allocation4]  }
 0x140   :  { %224 = dma.done.wait [#allocation4], 128  }
 0x141   :  { %225 = vsyncadd [#allocation4], 4294967168 }
 0x142   :  { %159 = vsyncpa [#allocation3], 1 }
 0x143   :  { %160 = vsyncpa [#allocation4], 1 }

</bundles_post_ra>
